<compile_context>
chip_gen: v5e
topology: v5e:2x2
jax: 0.10.0
libtpu: 0.0.40
codegen_flags: <defaults>
</compile_context>

<pallas_src>
import functools

import jax
import jax.numpy as jnp
from jax.experimental import pallas as pl
from jax.experimental.pallas import tpu as pltpu

_NEG_LARGE = -1e30  # finite "minus infinity" for masked (padded) memory columns


def _round_up(x, m):
    return ((x + m - 1) // m) * m


def _cm_lse_kernel(x_ref, ft_ref, m_ref, l_ref, *, inv_temp, tn, sub,
                   n_valid, needs_mask, compute_dtype):
    """Online logsumexp over a (D, tn) tile of the transposed cluster memory.

    Grid: axis 0 = memory split ("parallel", one per TensorCore on v7x),
          axis 1 = tn-column tiles within the split ("arbitrary"/reduction).
    The (squeezed) (B, 1) outputs m/l stay resident across axis 1 and act as the
    running max / running sum-of-exp of the scaled logits.
    """
    j = pl.program_id(1)
    nj = pl.num_programs(1)

    @pl.when(j == 0)
    def _():
        m_ref[...] = jnp.full_like(m_ref, -jnp.inf)
        l_ref[...] = jnp.zeros_like(l_ref)

    b = x_ref.shape[0]
    # Scale the small (B, D) inputs tile once (not the (B, tn) logits tile).
    x = (x_ref[...].astype(jnp.float32) * inv_temp).astype(compute_dtype)
    # First memory column covered by this grid step.
    col0 = (pl.program_id(0) * nj + j) * tn

    def body(c, carry):
        m, l = carry
        off = pl.multiple_of(c * sub, sub)
        f = ft_ref[:, pl.ds(off, sub)]                          # (D, sub)
        s = jax.lax.dot_general(                                # (B, sub) f32 accumulate
            x, f, dimension_numbers=(((1,), (0,)), ((), ())),
            preferred_element_type=jnp.float32)
        if needs_mask:
            col = jax.lax.broadcasted_iota(jnp.int32, (b, sub), 1) + (col0 + off)
            s = jnp.where(col < n_valid, s, _NEG_LARGE)
        m_new = jnp.maximum(m, jnp.max(s, axis=-1, keepdims=True))
        l = l * jnp.exp(m - m_new) + jnp.sum(jnp.exp(s - m_new),
                                             axis=-1, keepdims=True)
        return m_new, l

    m, l = jax.lax.fori_loop(0, tn // sub, body,
                             (m_ref[...], l_ref[...]), unroll=True)
    m_ref[...] = m
    l_ref[...] = l


def _default_n_splits():
    # v7x has 2 TensorCores per chip; a leading "parallel" grid axis of size 2
    # shards the memory split across them.  Single-TC chips (v5e/v6e) get 1.
    try:
        kind = jax.devices()[0].device_kind.lower()
        return 2 if "v7" in kind else 1
    except Exception:  # pragma: no cover
        return 1


def _choose_tiling(n_mem, n_splits, tn, sub):
    """Adapt (n_splits, tn, sub) to the memory size; return padded extents."""
    n_splits = max(1, int(n_splits))
    if n_mem < n_splits * 512:        # too small to benefit from a core split
        n_splits = 1
    per_split = -(-n_mem // n_splits)
    tn = min(_round_up(max(tn, 128), 128), _round_up(per_split, 128))
    sub = min(_round_up(max(sub, 128), 128), tn)
    tn = _round_up(tn, sub)           # inner sub-chunk loop tiles evenly
    blocks_per_split = -(-per_split // tn)
    padded_n = n_splits * blocks_per_split * tn
    return n_splits, tn, sub, blocks_per_split, padded_n


def cluster_memory_forward(inputs, targets, features, temp=0.05, *,
                           tn=8192, sub=512, n_splits=None, memory_dtype=None):
    """ClusterMemory(mode='CM').forward: mean cross-entropy over memory logits.

    inputs:   (B, D) batch features.
    targets:  (B,)   int cluster ids in [0, N).
    features: (N, D) cluster-memory bank (the module's `features` buffer).
    memory_dtype: optional storage dtype for the streamed bank (jnp.bfloat16
        halves HBM traffic; accumulation stays f32).
    """
    B, D = inputs.shape
    N, Df = features.shape
    assert Df == D
    inv_temp = 1.0 / float(temp)

    if n_splits is None:
        n_splits = _default_n_splits()
    n_splits, tn, sub, blocks_per_split, padded_n = _choose_tiling(N, n_splits, tn, sub)

    mem_dtype = jnp.dtype(memory_dtype if memory_dtype is not None else features.dtype)
    compute_dtype = jnp.float32 if mem_dtype == jnp.dtype(jnp.float32) else mem_dtype

    # Lane-dense transposed memory layout (D, padded_N).
    # NOTE: in a real training loop the bank should be *kept* persistently in this
    # (D, padded_N) / low-precision layout rather than re-prepared per call.
    features_t = features.T.astype(mem_dtype)
    if padded_n != N:
        features_t = jnp.pad(features_t, ((0, 0), (0, padded_n - N)))

    # Scoped-VMEM budget: double-buffered feature tile + inputs + partial outputs,
    # with lane padding to 128 accounted for; capped at 56 MiB (headroom on v7x's
    # 64 MiB physical VMEM), never below the 32 MiB default.
    feat_blk = _round_up(D, 16) * tn * mem_dtype.itemsize
    in_blk = _round_up(B, 8) * _round_up(D, 128) * jnp.dtype(inputs.dtype).itemsize
    out_blk = 2 * _round_up(B, 8) * 128 * 4
    needed = 2 * (feat_blk + in_blk + out_blk)
    vmem_limit = int(min(56 << 20, max(32 << 20, needed + (8 << 20))))

    kernel = functools.partial(
        _cm_lse_kernel, inv_temp=inv_temp, tn=tn, sub=sub,
        n_valid=N, needs_mask=(padded_n != N), compute_dtype=compute_dtype)

    part_shape = jax.ShapeDtypeStruct((n_splits, B, 1), jnp.float32)
    part_spec = pl.BlockSpec((None, B, 1), lambda p, j: (p, 0, 0))

    m_p, l_p = pl.pallas_call(
        kernel,
        out_shape=(part_shape, part_shape),
        grid_spec=pltpu.PrefetchScalarGridSpec(
            num_scalar_prefetch=0,
            grid=(n_splits, blocks_per_split),
            in_specs=[
                # inputs: resident (B, D)
                pl.BlockSpec((B, D), lambda p, j: (0, 0)),
                # transposed memory: lane-dense (D, tn) column tile.
                # (Add pipeline_mode=pl.Buffered(3) here if a trace shows exposed
                #  DMA at very small B and VMEM headroom allows.)
                pl.BlockSpec((D, tn),
                             lambda p, j, _bps=blocks_per_split: (0, p * _bps + j)),
            ],
            out_specs=(part_spec, part_spec),
        ),
        compiler_params=pltpu.CompilerParams(
            dimension_semantics=("parallel", "arbitrary"),
            vmem_limit_bytes=vmem_limit,
        ),
    )(inputs, features_t)

    # Combine per-split partial logsumexps (tiny (n_splits, B, 1) arrays).
    m_all = jnp.max(m_p, axis=0)                               # (B, 1)
    l_all = jnp.sum(l_p * jnp.exp(m_p - m_all), axis=0)        # (B, 1)
    lse = (m_all + jnp.log(l_all))[:, 0]                       # (B,)

    # Positive (target-class) logit: tiny (B, D) gather in the wrapper, using the
    # same scaling / cast chain as the kernel for consistency.
    tgt = targets.astype(jnp.int32)
    f_pos = jnp.take(features_t, tgt, axis=1).astype(jnp.float32)          # (D, B)
    xs = (inputs.astype(jnp.float32) * inv_temp).astype(compute_dtype)
    pos = jnp.sum(xs.astype(jnp.float32) * f_pos.T, axis=1)                # (B,)

    # per-sample NLL = logsumexp(logits) - logit[target]; mean over batch.
    return jnp.mean(lse - pos)


if __name__ == "__main__":
    key = jax.random.PRNGKey(0)
    k1, k2, k3 = jax.random.split(key, 3)

    B = 8        # batch
    D = 64       # num_features
    N = 3000     # num_samples (not a tile multiple -> exercises padding/masking)
    TEMP = 0.05

    # Deterministic synthetic parameters / inputs (module registers a zero buffer;
    # init the memory with normalized random vectors so the forward is non-degenerate).
    inputs = jax.random.normal(k1, (B, D), dtype=jnp.float32)
    inputs = inputs / jnp.linalg.norm(inputs, axis=1, keepdims=True)
    features = jax.random.normal(k2, (N, D), dtype=jnp.float32)
    features = features / jnp.linalg.norm(features, axis=1, keepdims=True)
    targets = jax.random.randint(k3, (B,), 0, N, dtype=jnp.int32)

    # Pure-JAX reference of the module's forward.
    logits = (inputs @ features.T) / TEMP
    ref = jnp.mean(jax.nn.logsumexp(logits, axis=1) - logits[jnp.arange(B), targets])

    # 1) Default config (auto n_splits, large lane-dense tiles), f32 memory.
    loss = jax.block_until_ready(
        cluster_memory_forward(inputs, targets, features, temp=TEMP))
    assert jnp.allclose(loss, ref, rtol=1e-4, atol=1e-4), (loss, ref)

    # 2) Force the v7x-style 2-way core split + small tiles so the grid
    #    accumulation, sub-chunk loop and padded-column masking all execute.
    loss2 = jax.block_until_ready(
        cluster_memory_forward(inputs, targets, features, temp=TEMP,
                               n_splits=2, tn=512, sub=256))
    assert jnp.allclose(loss2, ref, rtol=1e-4, atol=1e-4), (loss2, ref)

    # 3) bf16 memory bank (halves HBM streaming); compare against a reference
    #    built from the same bf16-rounded operands.
    loss3 = jax.block_until_ready(
        cluster_memory_forward(inputs, targets, features, temp=TEMP,
                               n_splits=2, memory_dtype=jnp.bfloat16))
    x16 = (inputs * jnp.float32(1.0 / TEMP)).astype(jnp.bfloat16).astype(jnp.float32)
    f16 = features.astype(jnp.bfloat16).astype(jnp.float32)
    logits16 = x16 @ f16.T
    ref16 = jnp.mean(jax.nn.logsumexp(logits16, axis=1)
                     - logits16[jnp.arange(B), targets])
    assert jnp.allclose(loss3, ref16, rtol=1e-3, atol=1e-3), (loss3, ref16)

    print("KERNEL_OK")
</pallas_src>

<mosaic_0001>
module attributes {stable_mosaic.version = 11 : i64} {
  func.func @_cm_lse_kernel(%arg0: i32, %arg1: i32, %arg2: memref<8x64xf32, #tpu.memory_space<vmem>>, %arg3: memref<64x3072xf32, #tpu.memory_space<vmem>>, %arg4: memref<1x8x1xf32, #tpu.memory_space<vmem>>, %arg5: memref<1x8x1xf32, #tpu.memory_space<vmem>>) attributes {dimension_semantics = [#tpu.dimension_semantics<parallel>, #tpu.dimension_semantics<arbitrary>], iteration_bounds = array<i64: 1, 1>, scalar_prefetch = 0 : i64, scratch_operands = 0 : i64, tpu.core_type = #tpu.core_type<tc>, window_params = [{pipeline_mode = #tpu.pipeline_mode<synchronous>, transform_indices = @transform_0, window_bounds = array<i64: 8, 64>}, {transform_indices = @transform_1, window_bounds = array<i64: 64, 3072>}, {transform_indices = @transform_2, window_bounds = array<i64: 1, 8, 1>}, {transform_indices = @transform_3, window_bounds = array<i64: 1, 8, 1>}]} {
    %c0_i32 = arith.constant 0 : i32
    %0 = arith.cmpi eq, %arg1, %c0_i32 : i32
    %1 = arith.extui %0 : i1 to i32
    %c0_i32_0 = arith.constant 0 : i32
    %2 = arith.cmpi ne, %1, %c0_i32_0 : i32
    scf.if %2 {
      %cst_56 = arith.constant 0xFF800000 : f32
      %169 = vector.broadcast %cst_56 : f32 to vector<8x1xf32>
      %c0_57 = arith.constant 0 : index
      %c0_58 = arith.constant 0 : index
      %c0_59 = arith.constant 0 : index
      %170 = vector.load %arg4[%c0_57, %c0_58, %c0_59] : memref<1x8x1xf32, #tpu.memory_space<vmem>>, vector<1x8x1xf32>
      %171 = vector.shape_cast %170 : vector<1x8x1xf32> to vector<8x1xf32>
      %172 = vector.shape_cast %169 : vector<8x1xf32> to vector<1x8x1xf32>
      tpu.vector_store %arg4[%c0_57, %c0_58, %c0_59], %172 {strides = array<i32>} : memref<1x8x1xf32, #tpu.memory_space<vmem>>, vector<1x8x1xf32>,
      %cst_60 = arith.constant 0.000000e+00 : f32
      %173 = vector.broadcast %cst_60 : f32 to vector<8x1xf32>
      %c0_61 = arith.constant 0 : index
      %c0_62 = arith.constant 0 : index
      %c0_63 = arith.constant 0 : index
      %174 = vector.load %arg5[%c0_61, %c0_62, %c0_63] : memref<1x8x1xf32, #tpu.memory_space<vmem>>, vector<1x8x1xf32>
      %175 = vector.shape_cast %174 : vector<1x8x1xf32> to vector<8x1xf32>
      %176 = vector.shape_cast %173 : vector<8x1xf32> to vector<1x8x1xf32>
      tpu.vector_store %arg5[%c0_61, %c0_62, %c0_63], %176 {strides = array<i32>} : memref<1x8x1xf32, #tpu.memory_space<vmem>>, vector<1x8x1xf32>,
    } else {
    }
    %c0 = arith.constant 0 : index
    %c0_1 = arith.constant 0 : index
    %3 = vector.load %arg2[%c0, %c0_1] : memref<8x64xf32, #tpu.memory_space<vmem>>, vector<8x64xf32>
    %cst = arith.constant 2.000000e+01 : f32
    %4 = vector.broadcast %cst : f32 to vector<8x64xf32>
    %5 = arith.mulf %3, %4 : vector<8x64xf32>
    %c1_i32 = arith.constant 1 : i32
    %6 = arith.muli %arg0, %c1_i32 : i32
    %7 = arith.addi %6, %arg1 : i32
    %c3072_i32 = arith.constant 3072 : i32
    %8 = arith.muli %7, %c3072_i32 : i32
    %c0_2 = arith.constant 0 : index
    %c0_3 = arith.constant 0 : index
    %c0_4 = arith.constant 0 : index
    %9 = vector.load %arg4[%c0_2, %c0_3, %c0_4] : memref<1x8x1xf32, #tpu.memory_space<vmem>>, vector<1x8x1xf32>
    %10 = vector.shape_cast %9 : vector<1x8x1xf32> to vector<8x1xf32>
    %c0_5 = arith.constant 0 : index
    %c0_6 = arith.constant 0 : index
    %c0_7 = arith.constant 0 : index
    %11 = vector.load %arg5[%c0_5, %c0_6, %c0_7] : memref<1x8x1xf32, #tpu.memory_space<vmem>>, vector<1x8x1xf32>
    %12 = vector.shape_cast %11 : vector<1x8x1xf32> to vector<8x1xf32>
    %c0_i32_8 = arith.constant 0 : i32
    %c512_i32 = arith.constant 512 : i32
    %13 = arith.muli %c0_i32_8, %c512_i32 : i32
    %14 = tpu.assume_multiple %13, 512 : i32
    %c0_9 = arith.constant 0 : index
    %15 = arith.index_cast %14 : i32 to index
    %16 = vector.load %arg3[%c0_9, %15] : memref<64x3072xf32, #tpu.memory_space<vmem>>, vector<64x512xf32>
    %cst_10 = arith.constant dense<0.000000e+00> : vector<8x512xf32>
    %17 = tpu.matmul %5, %16, %cst_10 {dimension_numbers = #tpu.dot_dimension_numbers<[1], [0], [0], [1], [0, 0, 1, 1], [], []>} : vector<8x64xf32>, vector<64x512xf32>, vector<8x512xf32> -> vector<8x512xf32>
    %18 = tpu.iota {dimensions = array<i32: 1>} : vector<8x512xi32>
    %19 = arith.addi %8, %14 : i32
    %20 = vector.broadcast %19 : i32 to vector<8x512xi32>
    %21 = arith.addi %18, %20 : vector<8x512xi32>
    %c3000_i32 = arith.constant 3000 : i32
    %22 = vector.broadcast %c3000_i32 : i32 to vector<8x512xi32>
    %23 = arith.cmpi slt, %21, %22 : vector<8x512xi32>
    %cst_11 = arith.constant -1.000000e+30 : f32
    %24 = vector.broadcast %cst_11 : f32 to vector<8x512xf32>
    %25 = arith.select %23, %17, %24 : vector<8x512xi1>, vector<8x512xf32>
    %cst_12 = arith.constant dense<0xFF800000> : vector<8xf32>
    %26 = vector.multi_reduction <maximumf>, %25, %cst_12 [1] : vector<8x512xf32> to vector<8xf32>
    %27 = vector.shape_cast %26 : vector<8xf32> to vector<8x1xf32>
    %28 = arith.maximumf %10, %27 : vector<8x1xf32>
    %29 = arith.subf %10, %28 : vector<8x1xf32>
    %30 = math.exp %29 : vector<8x1xf32>
    %31 = arith.mulf %12, %30 : vector<8x1xf32>
    %32 = vector.broadcast %28 : vector<8x1xf32> to vector<8x512xf32>
    %33 = arith.subf %25, %32 : vector<8x512xf32>
    %34 = math.exp %33 : vector<8x512xf32>
    %cst_13 = arith.constant dense<0.000000e+00> : vector<8xf32>
    %35 = vector.multi_reduction <add>, %34, %cst_13 [1] : vector<8x512xf32> to vector<8xf32>
    %36 = vector.shape_cast %35 : vector<8xf32> to vector<8x1xf32>
    %37 = arith.addf %31, %36 : vector<8x1xf32>
    %c1_i32_14 = arith.constant 1 : i32
    %c512_i32_15 = arith.constant 512 : i32
    %38 = arith.muli %c1_i32_14, %c512_i32_15 : i32
    %39 = tpu.assume_multiple %38, 512 : i32
    %c0_16 = arith.constant 0 : index
    %40 = arith.index_cast %39 : i32 to index
    %41 = vector.load %arg3[%c0_16, %40] : memref<64x3072xf32, #tpu.memory_space<vmem>>, vector<64x512xf32>
    %cst_17 = arith.constant dense<0.000000e+00> : vector<8x512xf32>
    %42 = tpu.matmul %5, %41, %cst_17 {dimension_numbers = #tpu.dot_dimension_numbers<[1], [0], [0], [1], [0, 0, 1, 1], [], []>} : vector<8x64xf32>, vector<64x512xf32>, vector<8x512xf32> -> vector<8x512xf32>
    %43 = tpu.iota {dimensions = array<i32: 1>} : vector<8x512xi32>
    %44 = arith.addi %8, %39 : i32
    %45 = vector.broadcast %44 : i32 to vector<8x512xi32>
    %46 = arith.addi %43, %45 : vector<8x512xi32>
    %c3000_i32_18 = arith.constant 3000 : i32
    %47 = vector.broadcast %c3000_i32_18 : i32 to vector<8x512xi32>
    %48 = arith.cmpi slt, %46, %47 : vector<8x512xi32>
    %cst_19 = arith.constant -1.000000e+30 : f32
    %49 = vector.broadcast %cst_19 : f32 to vector<8x512xf32>
    %50 = arith.select %48, %42, %49 : vector<8x512xi1>, vector<8x512xf32>
    %cst_20 = arith.constant dense<0xFF800000> : vector<8xf32>
    %51 = vector.multi_reduction <maximumf>, %50, %cst_20 [1] : vector<8x512xf32> to vector<8xf32>
    %52 = vector.shape_cast %51 : vector<8xf32> to vector<8x1xf32>
    %53 = arith.maximumf %28, %52 : vector<8x1xf32>
    %54 = arith.subf %28, %53 : vector<8x1xf32>
    %55 = math.exp %54 : vector<8x1xf32>
    %56 = arith.mulf %37, %55 : vector<8x1xf32>
    %57 = vector.broadcast %53 : vector<8x1xf32> to vector<8x512xf32>
    %58 = arith.subf %50, %57 : vector<8x512xf32>
    %59 = math.exp %58 : vector<8x512xf32>
    %cst_21 = arith.constant dense<0.000000e+00> : vector<8xf32>
    %60 = vector.multi_reduction <add>, %59, %cst_21 [1] : vector<8x512xf32> to vector<8xf32>
    %61 = vector.shape_cast %60 : vector<8xf32> to vector<8x1xf32>
    %62 = arith.addf %56, %61 : vector<8x1xf32>
    %c2_i32 = arith.constant 2 : i32
    %c512_i32_22 = arith.constant 512 : i32
    %63 = arith.muli %c2_i32, %c512_i32_22 : i32
    %64 = tpu.assume_multiple %63, 512 : i32
    %c0_23 = arith.constant 0 : index
    %65 = arith.index_cast %64 : i32 to index
    %66 = vector.load %arg3[%c0_23, %65] : memref<64x3072xf32, #tpu.memory_space<vmem>>, vector<64x512xf32>
    %cst_24 = arith.constant dense<0.000000e+00> : vector<8x512xf32>
    %67 = tpu.matmul %5, %66, %cst_24 {dimension_numbers = #tpu.dot_dimension_numbers<[1], [0], [0], [1], [0, 0, 1, 1], [], []>} : vector<8x64xf32>, vector<64x512xf32>, vector<8x512xf32> -> vector<8x512xf32>
    %68 = tpu.iota {dimensions = array<i32: 1>} : vector<8x512xi32>
    %69 = arith.addi %8, %64 : i32
    %70 = vector.broadcast %69 : i32 to vector<8x512xi32>
    %71 = arith.addi %68, %70 : vector<8x512xi32>
    %c3000_i32_25 = arith.constant 3000 : i32
    %72 = vector.broadcast %c3000_i32_25 : i32 to vector<8x512xi32>
    %73 = arith.cmpi slt, %71, %72 : vector<8x512xi32>
    %cst_26 = arith.constant -1.000000e+30 : f32
    %74 = vector.broadcast %cst_26 : f32 to vector<8x512xf32>
    %75 = arith.select %73, %67, %74 : vector<8x512xi1>, vector<8x512xf32>
    %cst_27 = arith.constant dense<0xFF800000> : vector<8xf32>
    %76 = vector.multi_reduction <maximumf>, %75, %cst_27 [1] : vector<8x512xf32> to vector<8xf32>
    %77 = vector.shape_cast %76 : vector<8xf32> to vector<8x1xf32>
    %78 = arith.maximumf %53, %77 : vector<8x1xf32>
    %79 = arith.subf %53, %78 : vector<8x1xf32>
    %80 = math.exp %79 : vector<8x1xf32>
    %81 = arith.mulf %62, %80 : vector<8x1xf32>
    %82 = vector.broadcast %78 : vector<8x1xf32> to vector<8x512xf32>
    %83 = arith.subf %75, %82 : vector<8x512xf32>
    %84 = math.exp %83 : vector<8x512xf32>
    %cst_28 = arith.constant dense<0.000000e+00> : vector<8xf32>
    %85 = vector.multi_reduction <add>, %84, %cst_28 [1] : vector<8x512xf32> to vector<8xf32>
    %86 = vector.shape_cast %85 : vector<8xf32> to vector<8x1xf32>
    %87 = arith.addf %81, %86 : vector<8x1xf32>
    %c3_i32 = arith.constant 3 : i32
    %c512_i32_29 = arith.constant 512 : i32
    %88 = arith.muli %c3_i32, %c512_i32_29 : i32
    %89 = tpu.assume_multiple %88, 512 : i32
    %c0_30 = arith.constant 0 : index
    %90 = arith.index_cast %89 : i32 to index
    %91 = vector.load %arg3[%c0_30, %90] : memref<64x3072xf32, #tpu.memory_space<vmem>>, vector<64x512xf32>
    %cst_31 = arith.constant dense<0.000000e+00> : vector<8x512xf32>
    %92 = tpu.matmul %5, %91, %cst_31 {dimension_numbers = #tpu.dot_dimension_numbers<[1], [0], [0], [1], [0, 0, 1, 1], [], []>} : vector<8x64xf32>, vector<64x512xf32>, vector<8x512xf32> -> vector<8x512xf32>
    %93 = tpu.iota {dimensions = array<i32: 1>} : vector<8x512xi32>
    %94 = arith.addi %8, %89 : i32
    %95 = vector.broadcast %94 : i32 to vector<8x512xi32>
    %96 = arith.addi %93, %95 : vector<8x512xi32>
    %c3000_i32_32 = arith.constant 3000 : i32
    %97 = vector.broadcast %c3000_i32_32 : i32 to vector<8x512xi32>
    %98 = arith.cmpi slt, %96, %97 : vector<8x512xi32>
    %cst_33 = arith.constant -1.000000e+30 : f32
    %99 = vector.broadcast %cst_33 : f32 to vector<8x512xf32>
    %100 = arith.select %98, %92, %99 : vector<8x512xi1>, vector<8x512xf32>
    %cst_34 = arith.constant dense<0xFF800000> : vector<8xf32>
    %101 = vector.multi_reduction <maximumf>, %100, %cst_34 [1] : vector<8x512xf32> to vector<8xf32>
    %102 = vector.shape_cast %101 : vector<8xf32> to vector<8x1xf32>
    %103 = arith.maximumf %78, %102 : vector<8x1xf32>
    %104 = arith.subf %78, %103 : vector<8x1xf32>
    %105 = math.exp %104 : vector<8x1xf32>
    %106 = arith.mulf %87, %105 : vector<8x1xf32>
    %107 = vector.broadcast %103 : vector<8x1xf32> to vector<8x512xf32>
    %108 = arith.subf %100, %107 : vector<8x512xf32>
    %109 = math.exp %108 : vector<8x512xf32>
    %cst_35 = arith.constant dense<0.000000e+00> : vector<8xf32>
    %110 = vector.multi_reduction <add>, %109, %cst_35 [1] : vector<8x512xf32> to vector<8xf32>
    %111 = vector.shape_cast %110 : vector<8xf32> to vector<8x1xf32>
    %112 = arith.addf %106, %111 : vector<8x1xf32>
    %c4_i32 = arith.constant 4 : i32
    %c512_i32_36 = arith.constant 512 : i32
    %113 = arith.muli %c4_i32, %c512_i32_36 : i32
    %114 = tpu.assume_multiple %113, 512 : i32
    %c0_37 = arith.constant 0 : index
    %115 = arith.index_cast %114 : i32 to index
    %116 = vector.load %arg3[%c0_37, %115] : memref<64x3072xf32, #tpu.memory_space<vmem>>, vector<64x512xf32>
    %cst_38 = arith.constant dense<0.000000e+00> : vector<8x512xf32>
    %117 = tpu.matmul %5, %116, %cst_38 {dimension_numbers = #tpu.dot_dimension_numbers<[1], [0], [0], [1], [0, 0, 1, 1], [], []>} : vector<8x64xf32>, vector<64x512xf32>, vector<8x512xf32> -> vector<8x512xf32>
    %118 = tpu.iota {dimensions = array<i32: 1>} : vector<8x512xi32>
    %119 = arith.addi %8, %114 : i32
    %120 = vector.broadcast %119 : i32 to vector<8x512xi32>
    %121 = arith.addi %118, %120 : vector<8x512xi32>
    %c3000_i32_39 = arith.constant 3000 : i32
    %122 = vector.broadcast %c3000_i32_39 : i32 to vector<8x512xi32>
    %123 = arith.cmpi slt, %121, %122 : vector<8x512xi32>
    %cst_40 = arith.constant -1.000000e+30 : f32
    %124 = vector.broadcast %cst_40 : f32 to vector<8x512xf32>
    %125 = arith.select %123, %117, %124 : vector<8x512xi1>, vector<8x512xf32>
    %cst_41 = arith.constant dense<0xFF800000> : vector<8xf32>
    %126 = vector.multi_reduction <maximumf>, %125, %cst_41 [1] : vector<8x512xf32> to vector<8xf32>
    %127 = vector.shape_cast %126 : vector<8xf32> to vector<8x1xf32>
    %128 = arith.maximumf %103, %127 : vector<8x1xf32>
    %129 = arith.subf %103, %128 : vector<8x1xf32>
    %130 = math.exp %129 : vector<8x1xf32>
    %131 = arith.mulf %112, %130 : vector<8x1xf32>
    %132 = vector.broadcast %128 : vector<8x1xf32> to vector<8x512xf32>
    %133 = arith.subf %125, %132 : vector<8x512xf32>
    %134 = math.exp %133 : vector<8x512xf32>
    %cst_42 = arith.constant dense<0.000000e+00> : vector<8xf32>
    %135 = vector.multi_reduction <add>, %134, %cst_42 [1] : vector<8x512xf32> to vector<8xf32>
    %136 = vector.shape_cast %135 : vector<8xf32> to vector<8x1xf32>
    %137 = arith.addf %131, %136 : vector<8x1xf32>
    %c5_i32 = arith.constant 5 : i32
    %c512_i32_43 = arith.constant 512 : i32
    %138 = arith.muli %c5_i32, %c512_i32_43 : i32
    %139 = tpu.assume_multiple %138, 512 : i32
    %c0_44 = arith.constant 0 : index
    %140 = arith.index_cast %139 : i32 to index
    %141 = vector.load %arg3[%c0_44, %140] : memref<64x3072xf32, #tpu.memory_space<vmem>>, vector<64x512xf32>
    %cst_45 = arith.constant dense<0.000000e+00> : vector<8x512xf32>
    %142 = tpu.matmul %5, %141, %cst_45 {dimension_numbers = #tpu.dot_dimension_numbers<[1], [0], [0], [1], [0, 0, 1, 1], [], []>} : vector<8x64xf32>, vector<64x512xf32>, vector<8x512xf32> -> vector<8x512xf32>
    %143 = tpu.iota {dimensions = array<i32: 1>} : vector<8x512xi32>
    %144 = arith.addi %8, %139 : i32
    %145 = vector.broadcast %144 : i32 to vector<8x512xi32>
    %146 = arith.addi %143, %145 : vector<8x512xi32>
    %c3000_i32_46 = arith.constant 3000 : i32
    %147 = vector.broadcast %c3000_i32_46 : i32 to vector<8x512xi32>
    %148 = arith.cmpi slt, %146, %147 : vector<8x512xi32>
    %cst_47 = arith.constant -1.000000e+30 : f32
    %149 = vector.broadcast %cst_47 : f32 to vector<8x512xf32>
    %150 = arith.select %148, %142, %149 : vector<8x512xi1>, vector<8x512xf32>
    %cst_48 = arith.constant dense<0xFF800000> : vector<8xf32>
    %151 = vector.multi_reduction <maximumf>, %150, %cst_48 [1] : vector<8x512xf32> to vector<8xf32>
    %152 = vector.shape_cast %151 : vector<8xf32> to vector<8x1xf32>
    %153 = arith.maximumf %128, %152 : vector<8x1xf32>
    %154 = arith.subf %128, %153 : vector<8x1xf32>
    %155 = math.exp %154 : vector<8x1xf32>
    %156 = arith.mulf %137, %155 : vector<8x1xf32>
    %157 = vector.broadcast %153 : vector<8x1xf32> to vector<8x512xf32>
    %158 = arith.subf %150, %157 : vector<8x512xf32>
    %159 = math.exp %158 : vector<8x512xf32>
    %cst_49 = arith.constant dense<0.000000e+00> : vector<8xf32>
    %160 = vector.multi_reduction <add>, %159, %cst_49 [1] : vector<8x512xf32> to vector<8xf32>
    %161 = vector.shape_cast %160 : vector<8xf32> to vector<8x1xf32>
    %162 = arith.addf %156, %161 : vector<8x1xf32>
    %c6_i32 = arith.constant 6 : i32
    %c0_50 = arith.constant 0 : index
    %c0_51 = arith.constant 0 : index
    %c0_52 = arith.constant 0 : index
    %163 = vector.load %arg4[%c0_50, %c0_51, %c0_52] : memref<1x8x1xf32, #tpu.memory_space<vmem>>, vector<1x8x1xf32>
    %164 = vector.shape_cast %163 : vector<1x8x1xf32> to vector<8x1xf32>
    %165 = vector.shape_cast %153 : vector<8x1xf32> to vector<1x8x1xf32>
    tpu.vector_store %arg4[%c0_50, %c0_51, %c0_52], %165 {strides = array<i32>} : memref<1x8x1xf32, #tpu.memory_space<vmem>>, vector<1x8x1xf32>,
    %c0_53 = arith.constant 0 : index
    %c0_54 = arith.constant 0 : index
    %c0_55 = arith.constant 0 : index
    %166 = vector.load %arg5[%c0_53, %c0_54, %c0_55] : memref<1x8x1xf32, #tpu.memory_space<vmem>>, vector<1x8x1xf32>
    %167 = vector.shape_cast %166 : vector<1x8x1xf32> to vector<8x1xf32>
    %168 = vector.shape_cast %162 : vector<8x1xf32> to vector<1x8x1xf32>
    tpu.vector_store %arg5[%c0_53, %c0_54, %c0_55], %168 {strides = array<i32>} : memref<1x8x1xf32, #tpu.memory_space<vmem>>, vector<1x8x1xf32>,
    return
  }
  func.func @transform_0(%arg0: i32, %arg1: i32) -> (i32, i32) {
    %c0_i32 = arith.constant 0 : i32
    %c0_i32_0 = arith.constant 0 : i32
    %c0_i32_1 = arith.constant 0 : i32
    return %c0_i32, %c0_i32_0 : i32, i32
  }
  func.func @transform_1(%arg0: i32, %arg1: i32) -> (i32, i32) {
    %c1_i32 = arith.constant 1 : i32
    %0 = arith.muli %arg0, %c1_i32 : i32
    %1 = arith.addi %0, %arg1 : i32
    %c0_i32 = arith.constant 0 : i32
    %c0_i32_0 = arith.constant 0 : i32
    return %c0_i32, %1 : i32, i32
  }
  func.func @transform_2(%arg0: i32, %arg1: i32) -> (i32, i32, i32) {
    %c0_i32 = arith.constant 0 : i32
    %c0_i32_0 = arith.constant 0 : i32
    %c0_i32_1 = arith.constant 0 : i32
    return %arg0, %c0_i32, %c0_i32_0 : i32, i32, i32
  }
  func.func @transform_3(%arg0: i32, %arg1: i32) -> (i32, i32, i32) {
    %c0_i32 = arith.constant 0 : i32
    %c0_i32_0 = arith.constant 0 : i32
    %c0_i32_1 = arith.constant 0 : i32
    return %arg0, %c0_i32, %c0_i32_0 : i32, i32, i32
  }
}

</mosaic_0001>

<bundles_post_ra>
// kernel: tpu_custom_call.1
= control target key start
LH: loop header
LB: loop body
LE: loop exit
PB: predicated region body
PF: predicated region fallthrough
CT: control target
= control target key end

     0   :  { %9 = vsyncpa [#allocation3], 0  ;;  %s1444_s0 = inlined_call_operand.hbm [shape: f32[8,64], index: 0, kind: input, shape index: {}]   ;;  %s1445_s1 = inlined_call_operand.hbm [shape: f32[64,3072], index: 1, kind: input, shape index: {}]   ;;  %s1446_s2 = inlined_call_operand.vmem [shape: f32[1,8,1], index: 2, kind: output, shape index: {0}]   ;;  %s1447_s3 = inlined_call_operand.vmem [shape: f32[1,8,1], index: 3, kind: output, shape index: {1}]  }
   0x1   :  { %s16_s14 = sshll.u32 %s1444_s0, 4  ;;  %s17_s14 = int_to_ptr.hbm [resolvable:$true] %s16_s14 }
   0x2   :  { %10 = vsyncpa [#allocation5], 0  ;;  %s1189_s15 = smov [#allocation2]   ;;  %s30_s19 = sshll.u32 %s1445_s1, 4  ;;  %s31_s19 = int_to_ptr.hbm [resolvable:$true] %s30_s19 }
   0x3   :  { %s18_s16 = sshll.u32 %s1189_s15, 4  ;;  %s1190_s20 = smov [#allocation4]   ;;  %s19_s16 = int_to_ptr.vmem [resolvable:$true] %s18_s16 }
   0x4   :  { %21 = dma.hbm_to_vmem [thread:$0]  %s17_s14, 128, %s19_s16, [#allocation3]  }
   0x5   :  { %s32_s21 = sshll.u32 %s1190_s20, 4  ;;  %s1191_s22 = smov 3072   ;;  %s33_s21 = int_to_ptr.vmem [resolvable:$true] %s32_s21 }
   0x6   :  { %s1192_s23 = smov 192  }
   0x7   :  { %38 = dma.hbm_to_vmem [thread:$0]  %s31_s19, 24576, %s33_s21, [#allocation5], %s1191_s22, %s1191_s22, %s1192_s23  }
   0x8   :  { %1185 = dma.done.wait [#allocation3], 128  }
   0x9   :  { %1186 = vsyncadd [#allocation3], 4294967168 }
   0xa   :  { %1187 = dma.done.wait [#allocation5], 24576  }
   0xb   :  { %1188 = vsyncadd [#allocation5], 4294942720  ;;  %v92_v0 = vld [vmem:[#allocation4 + $0x550] sm:$0xff]  ;;  %v93_v1 = vld [vmem:[#allocation4 + $0x558] sm:$0xff]  ;;  %vm94_vm0 = vcmask 523264   ;;  %vm53_vm1 = vcmask 7168  }
   0xc   :  { %v88_v2 = vld [vmem:[#allocation4 + $0x490] sm:$0xff]  ;;  %146 = vmatpush.msra.mxu2 %v92_v0  ;;  %166 = vmatpush.msra.mxu3 %v93_v1  ;;  %v89_v3 = vld [vmem:[#allocation4 + $0x498] sm:$0xff]  ;;  %v90_v6 = vld [vmem:[#allocation4 + $0x540] sm:$0xff] }
   0xd   :  { %v84_v4 = vld [vmem:[#allocation4 + $0x3d0] sm:$0xff]  ;;  %v85_v5 = vld [vmem:[#allocation4 + $0x3d8] sm:$0xff]  ;;  %v91_v7 = vld [vmem:[#allocation4 + $0x548] sm:$0xff]  ;;  %106 = vmatpush.msra.mxu0 %v90_v6 }
   0xe   :  { %147 = vmatpush.msra.mxu2 %v88_v2  ;;  %167 = vmatpush.msra.mxu3 %v89_v3  ;;  %v86_v8 = vld [vmem:[#allocation4 + $0x480] sm:$0xff]  ;;  %v87_v9 = vld [vmem:[#allocation4 + $0x488] sm:$0xff]  ;;  %v80_v10 = vld [vmem:[#allocation4 + $0x310] sm:$0xff] }
   0xf   :  { %126 = vmatpush.msra.mxu1 %v91_v7  ;;  %v81_v11 = vld [vmem:[#allocation4 + $0x318] sm:$0xff]  ;;  %v82_v12 = vld [vmem:[#allocation4 + $0x3c0] sm:$0xff]  ;;  %v83_v13 = vld [vmem:[#allocation4 + $0x3c8] sm:$0xff]  ;;  %107 = vmatpush.msra.mxu0 %v86_v8 }
  0x10   :  { %148 = vmatpush.msra.mxu2 %v84_v4  ;;  %168 = vmatpush.msra.mxu3 %v85_v5  ;;  %v76_v14 = vld [vmem:[#allocation4 + $0x250] sm:$0xff]  ;;  %v77_v15 = vld [vmem:[#allocation4 + $0x258] sm:$0xff]  ;;  %v78_v16 = vld [vmem:[#allocation4 + $0x300] sm:$0xff] }
  0x11   :  { %127 = vmatpush.msra.mxu1 %v87_v9  ;;  %v79_v17 = vld [vmem:[#allocation4 + $0x308] sm:$0xff]  ;;  %108 = vmatpush.msra.mxu0 %v82_v12  ;;  %v72_v18 = vld [vmem:[#allocation4 + $0x190] sm:$0xff]  ;;  %v73_v19 = vld [vmem:[#allocation4 + $0x198] sm:$0xff] }
  0x12   :  { %149 = vmatpush.msra.mxu2 %v80_v10  ;;  %169 = vmatpush.msra.mxu3 %v81_v11  ;;  %v74_v20 = vld [vmem:[#allocation4 + $0x240] sm:$0xff]  ;;  %v75_v21 = vld [vmem:[#allocation4 + $0x248] sm:$0xff]  ;;  %v56_v22 = vld [vmem:[#allocation2] sm:$0xff] }
  0x13   :  { %128 = vmatpush.msra.mxu1 %v83_v13  ;;  %109 = vmatpush.msra.mxu0 %v78_v16  ;;  %v68_v23 = vld [vmem:[#allocation4 + $0xd0] sm:$0xff]  ;;  %v69_v24 = vld [vmem:[#allocation4 + $0xd8] sm:$0xff]  ;;  %v70_v25 = vld [vmem:[#allocation4 + $0x180] sm:$0xff]  ;;  %v1222_v29 = vmul.f32 20.0, %v56_v22 }
  0x14   :  { %150 = vmatpush.msra.mxu2 %v76_v14  ;;  %170 = vmatpush.msra.mxu3 %v77_v15  ;;  %v71_v26 = vld [vmem:[#allocation4 + $0x188] sm:$0xff]  ;;  %v64_v27 = vld [vmem:[#allocation4 + $0x10] sm:$0xff]  ;;  %v65_v28 = vld [vmem:[#allocation4 + $0x18] sm:$0xff] }
  0x15   :  { %129 = vmatpush.msra.mxu1 %v79_v17  ;;  %110 = vmatpush.msra.mxu0 %v74_v20  ;;  %v261_v30 = vld [vmem:[#allocation4 + $0x570] sm:$0xff]  ;;  %v262_v31 = vld [vmem:[#allocation4 + $0x578] sm:$0xff]  ;;  %v66_v32 = vld [vmem:[#allocation4 + $0xc0] sm:$0xff] }
  0x16   :  { %151 = vmatpush.msra.mxu2 %v72_v18  ;;  %171 = vmatpush.msra.mxu3 %v73_v19  ;;  %v67_v33 = vld [vmem:[#allocation4 + $0xc8] sm:$0xff]  ;;  %v257_v34 = vld [vmem:[#allocation4 + $0x4b0] sm:$0xff]  ;;  %v258_v35 = vld [vmem:[#allocation4 + $0x4b8] sm:$0xff] }
  0x17   :  { %130 = vmatpush.msra.mxu1 %v75_v21  ;;  %111 = vmatpush.msra.mxu0 %v70_v25  ;;  %v62_v36 = vld [vmem:[#allocation4] sm:$0xff]  ;;  %v63_v37 = vld [vmem:[#allocation4 + $0x8] sm:$0xff]  ;;  %v253_v38 = vld [vmem:[#allocation4 + $0x3f0] sm:$0xff] }
  0x18   :  { %152 = vmatpush.msra.mxu2 %v68_v23  ;;  %172 = vmatpush.msra.mxu3 %v69_v24  ;;  %v254_v39 = vld [vmem:[#allocation4 + $0x3f8] sm:$0xff]  ;;  %v259_v40 = vld [vmem:[#allocation4 + $0x560] sm:$0xff]  ;;  %v260_v41 = vld [vmem:[#allocation4 + $0x568] sm:$0xff] }
  0x19   :  { %131 = vmatpush.msra.mxu1 %v71_v26  ;;  %112 = vmatpush.msra.mxu0 %v66_v32  ;;  %v249_v42 = vld [vmem:[#allocation4 + $0x330] sm:$0xff]  ;;  %v250_v43 = vld [vmem:[#allocation4 + $0x338] sm:$0xff]  ;;  %v255_v44 = vld [vmem:[#allocation4 + $0x4a0] sm:$0xff] }
  0x1a   :  { %153 = vmatpush.msra.mxu2 %v64_v27  ;;  %173 = vmatpush.msra.mxu3 %v65_v28  ;;  %v256_v45 = vld [vmem:[#allocation4 + $0x4a8] sm:$0xff]  ;;  %v245_v46 = vld [vmem:[#allocation4 + $0x270] sm:$0xff]  ;;  %v246_v47 = vld [vmem:[#allocation4 + $0x278] sm:$0xff] }
  0x1b   :  { %1045 = vmatmul.msk.f32.vlgmr.msra.gmra.mxu2 %vm94_vm0, %v1222_v29  ;;  %1046 = vmatmul.msk.f32.vlgmr.msra.gmra.mxu3 %vm94_vm0, %v1222_v29  ;;  %v251_v48 = vld [vmem:[#allocation4 + $0x3e0] sm:$0xff]  ;;  %v252_v49 = vld [vmem:[#allocation4 + $0x3e8] sm:$0xff]  ;;  %v241_v50 = vld [vmem:[#allocation4 + $0x1b0] sm:$0xff] }
  0x1c   :  { %311 = vmatpush.msrb.mxu2 %v261_v30  ;;  %331 = vmatpush.msrb.mxu3 %v262_v31  ;;  %v242_v51 = vld [vmem:[#allocation4 + $0x1b8] sm:$0xff]  ;;  %v247_v52 = vld [vmem:[#allocation4 + $0x320] sm:$0xff]  ;;  %v248_v53 = vld [vmem:[#allocation4 + $0x328] sm:$0xff] }
  0x1d   :  { %132 = vmatpush.msra.mxu1 %v67_v33  ;;  %113 = vmatpush.msra.mxu0 %v62_v36  ;;  %v237_v54 = vld [vmem:[#allocation4 + $0xf0] sm:$0xff]  ;;  %v238_v55 = vld [vmem:[#allocation4 + $0xf8] sm:$0xff]  ;;  %v243_v56 = vld [vmem:[#allocation4 + $0x260] sm:$0xff] }
  0x1e   :  { %312 = vmatpush.msrb.mxu2 %v257_v34  ;;  %332 = vmatpush.msrb.mxu3 %v258_v35  ;;  %v244_v57 = vld [vmem:[#allocation4 + $0x268] sm:$0xff]  ;;  %v233_v58 = vld [vmem:[#allocation4 + $0x30] sm:$0xff]  ;;  %v234_v59 = vld [vmem:[#allocation4 + $0x38] sm:$0xff] }
  0x1f   :  { %133 = vmatpush.msra.mxu1 %v63_v37  ;;  %1043 = vmatmul.msk.f32.vlgmr.msra.gmra.mxu0 %vm94_vm0, %v1222_v29  ;;  %v421_v60 = vld [vmem:[#allocation4 + $0x590] sm:$0xff]  ;;  %v422_v61 = vld [vmem:[#allocation4 + $0x598] sm:$0xff]  ;;  %v239_v62 = vld [vmem:[#allocation4 + $0x1a0] sm:$0xff] }
  0x20   :  { %313 = vmatpush.msrb.mxu2 %v253_v38  ;;  %333 = vmatpush.msrb.mxu3 %v254_v39  ;;  %v240_v63 = vld [vmem:[#allocation4 + $0x1a8] sm:$0xff]  ;;  %v417_v0 = vld [vmem:[#allocation4 + $0x4d0] sm:$0xff]  ;;  %v418_v1 = vld [vmem:[#allocation4 + $0x4d8] sm:$0xff] }
  0x21   :  { %1044 = vmatmul.msk.f32.vlgmr.msra.gmra.mxu1 %vm94_vm0, %v1222_v29  ;;  %271 = vmatpush.msrb.mxu0 %v259_v40  ;;  %v235_v2 = vld [vmem:[#allocation4 + $0xe0] sm:$0xff]  ;;  %v236_v3 = vld [vmem:[#allocation4 + $0xe8] sm:$0xff]  ;;  %v413_v4 = vld [vmem:[#allocation4 + $0x410] sm:$0xff] }
  0x22   :  { %291 = vmatpush.msrb.mxu1 %v260_v41  ;;  %314 = vmatpush.msrb.mxu2 %v249_v42  ;;  %v414_v5 = vld [vmem:[#allocation4 + $0x418] sm:$0xff]  ;;  %v231_v6 = vld [vmem:[#allocation4 + $0x20] sm:$0xff]  ;;  %v232_v7 = vld [vmem:[#allocation4 + $0x28] sm:$0xff] }
  0x23   :  { %334 = vmatpush.msrb.mxu3 %v250_v43  ;;  %272 = vmatpush.msrb.mxu0 %v255_v44  ;;  %v419_v8 = vld [vmem:[#allocation4 + $0x580] sm:$0xff]  ;;  %v420_v9 = vld [vmem:[#allocation4 + $0x588] sm:$0xff]  ;;  %v409_v10 = vld [vmem:[#allocation4 + $0x350] sm:$0xff] }
  0x24   :  { %292 = vmatpush.msrb.mxu1 %v256_v45  ;;  %315 = vmatpush.msrb.mxu2 %v245_v46  ;;  %v410_v11 = vld [vmem:[#allocation4 + $0x358] sm:$0xff]  ;;  %v415_v12 = vld [vmem:[#allocation4 + $0x4c0] sm:$0xff]  ;;  %v416_v13 = vld [vmem:[#allocation4 + $0x4c8] sm:$0xff] }
  0x25   :  { %335 = vmatpush.msrb.mxu3 %v246_v47  ;;  %273 = vmatpush.msrb.mxu0 %v251_v48  ;;  %v405_v14 = vld [vmem:[#allocation4 + $0x290] sm:$0xff]  ;;  %v406_v15 = vld [vmem:[#allocation4 + $0x298] sm:$0xff]  ;;  %v411_v16 = vld [vmem:[#allocation4 + $0x400] sm:$0xff] }
  0x26   :  { %293 = vmatpush.msrb.mxu1 %v252_v49  ;;  %316 = vmatpush.msrb.mxu2 %v241_v50  ;;  %v412_v17 = vld [vmem:[#allocation4 + $0x408] sm:$0xff]  ;;  %v401_v18 = vld [vmem:[#allocation4 + $0x1d0] sm:$0xff]  ;;  %v402_v19 = vld [vmem:[#allocation4 + $0x1d8] sm:$0xff] }
  0x27   :  { %336 = vmatpush.msrb.mxu3 %v242_v51  ;;  %274 = vmatpush.msrb.mxu0 %v247_v52  ;;  %v407_v20 = vld [vmem:[#allocation4 + $0x340] sm:$0xff]  ;;  %v408_v21 = vld [vmem:[#allocation4 + $0x348] sm:$0xff]  ;;  %v397_v22 = vld [vmem:[#allocation4 + $0x110] sm:$0xff] }
  0x28   :  { %294 = vmatpush.msrb.mxu1 %v248_v53  ;;  %317 = vmatpush.msrb.mxu2 %v237_v54  ;;  %v398_v23 = vld [vmem:[#allocation4 + $0x118] sm:$0xff]  ;;  %v403_v24 = vld [vmem:[#allocation4 + $0x280] sm:$0xff]  ;;  %v404_v25 = vld [vmem:[#allocation4 + $0x288] sm:$0xff] }
  0x29   :  { %337 = vmatpush.msrb.mxu3 %v238_v55  ;;  %275 = vmatpush.msrb.mxu0 %v243_v56  ;;  %v393_v26 = vld [vmem:[#allocation4 + $0x50] sm:$0xff]  ;;  %v394_v27 = vld [vmem:[#allocation4 + $0x58] sm:$0xff]  ;;  %v399_v31 = vld [vmem:[#allocation4 + $0x1c0] sm:$0xff] }
  0x2a   :  { %295 = vmatpush.msrb.mxu1 %v244_v57  ;;  %318 = vmatpush.msrb.mxu2 %v233_v58  ;;  %v581_v28 = vld [vmem:[#allocation4 + $0x5b0] sm:$0xff]  ;;  %v582_v30 = vld [vmem:[#allocation4 + $0x5b8] sm:$0xff]  ;;  %v400_v32 = vld [vmem:[#allocation4 + $0x1c8] sm:$0xff] }
  0x2b   :  { %338 = vmatpush.msrb.mxu3 %v234_v59  ;;  %1049 = vmatmul.msk.f32.vlgmr.msrb.gmra.mxu2 %vm94_vm0, %v1222_v29  ;;  %v577_v33 = vld [vmem:[#allocation4 + $0x4f0] sm:$0xff]  ;;  %v578_v34 = vld [vmem:[#allocation4 + $0x4f8] sm:$0xff]  ;;  %v395_v35 = vld [vmem:[#allocation4 + $0x100] sm:$0xff] }
  0x2c   :  { %1050 = vmatmul.msk.f32.vlgmr.msrb.gmra.mxu3 %vm94_vm0, %v1222_v29  ;;  %471 = vmatpush.msra.mxu2 %v421_v60  ;;  %v396_v36 = vld [vmem:[#allocation4 + $0x108] sm:$0xff]  ;;  %v573_v37 = vld [vmem:[#allocation4 + $0x430] sm:$0xff]  ;;  %v574_v38 = vld [vmem:[#allocation4 + $0x438] sm:$0xff] }
  0x2d   :  { %491 = vmatpush.msra.mxu3 %v422_v61  ;;  %276 = vmatpush.msrb.mxu0 %v239_v62  ;;  %v391_v39 = vld [vmem:[#allocation4 + $0x40] sm:$0xff]  ;;  %v392_v40 = vld [vmem:[#allocation4 + $0x48] sm:$0xff]  ;;  %v569_v43 = vld [vmem:[#allocation4 + $0x370] sm:$0xff] }
  0x2e   :  { %296 = vmatpush.msrb.mxu1 %v240_v63  ;;  %472 = vmatpush.msra.mxu2 %v417_v0  ;;  %v579_v41 = vld [vmem:[#allocation4 + $0x5a0] sm:$0xff]  ;;  %v580_v42 = vld [vmem:[#allocation4 + $0x5a8] sm:$0xff]  ;;  %v570_v44 = vld [vmem:[#allocation4 + $0x378] sm:$0xff] }
  0x2f   :  { %492 = vmatpush.msra.mxu3 %v418_v1  ;;  %277 = vmatpush.msrb.mxu0 %v235_v2  ;;  %v575_v45 = vld [vmem:[#allocation4 + $0x4e0] sm:$0xff]  ;;  %v576_v46 = vld [vmem:[#allocation4 + $0x4e8] sm:$0xff]  ;;  %v565_v47 = vld [vmem:[#allocation4 + $0x2b0] sm:$0xff] }
  0x30   :  { %297 = vmatpush.msrb.mxu1 %v236_v3  ;;  %473 = vmatpush.msra.mxu2 %v413_v4  ;;  %v566_v48 = vld [vmem:[#allocation4 + $0x2b8] sm:$0xff]  ;;  %v571_v49 = vld [vmem:[#allocation4 + $0x420] sm:$0xff]  ;;  %v572_v50 = vld [vmem:[#allocation4 + $0x428] sm:$0xff] }
  0x31   :  { %493 = vmatpush.msra.mxu3 %v414_v5  ;;  %278 = vmatpush.msrb.mxu0 %v231_v6  ;;  %v561_v51 = vld [vmem:[#allocation4 + $0x1f0] sm:$0xff]  ;;  %v562_v52 = vld [vmem:[#allocation4 + $0x1f8] sm:$0xff]  ;;  %v567_v53 = vld [vmem:[#allocation4 + $0x360] sm:$0xff] }
  0x32   :  { %298 = vmatpush.msrb.mxu1 %v232_v7  ;;  %1047 = vmatmul.msk.f32.vlgmr.msrb.gmra.mxu0 %vm94_vm0, %v1222_v29  ;;  %v568_v54 = vld [vmem:[#allocation4 + $0x368] sm:$0xff]  ;;  %v557_v55 = vld [vmem:[#allocation4 + $0x130] sm:$0xff]  ;;  %v558_v56 = vld [vmem:[#allocation4 + $0x138] sm:$0xff] }
  0x33   :  { %1048 = vmatmul.msk.f32.vlgmr.msrb.gmra.mxu1 %vm94_vm0, %v1222_v29  ;;  %431 = vmatpush.msra.mxu0 %v419_v8  ;;  %v563_v57 = vld [vmem:[#allocation4 + $0x2a0] sm:$0xff]  ;;  %v564_v58 = vld [vmem:[#allocation4 + $0x2a8] sm:$0xff]  ;;  %v553_v59 = vld [vmem:[#allocation4 + $0x70] sm:$0xff] }
  0x34   :  { %451 = vmatpush.msra.mxu1 %v420_v9  ;;  %474 = vmatpush.msra.mxu2 %v409_v10  ;;  %v554_v60 = vld [vmem:[#allocation4 + $0x78] sm:$0xff]  ;;  %v741_v61 = vld [vmem:[#allocation4 + $0x5d0] sm:$0xff]  ;;  %v559_v63 = vld [vmem:[#allocation4 + $0x1e0] sm:$0xff] }
  0x35   :  { %494 = vmatpush.msra.mxu3 %v410_v11  ;;  %432 = vmatpush.msra.mxu0 %v415_v12  ;;  %v742_v62 = vld [vmem:[#allocation4 + $0x5d8] sm:$0xff]  ;;  %v560_v0 = vld [vmem:[#allocation4 + $0x1e8] sm:$0xff]  ;;  %v737_v1 = vld [vmem:[#allocation4 + $0x510] sm:$0xff] }
  0x36   :  { %452 = vmatpush.msra.mxu1 %v416_v13  ;;  %475 = vmatpush.msra.mxu2 %v405_v14  ;;  %v738_v2 = vld [vmem:[#allocation4 + $0x518] sm:$0xff]  ;;  %v555_v3 = vld [vmem:[#allocation4 + $0x120] sm:$0xff]  ;;  %v556_v4 = vld [vmem:[#allocation4 + $0x128] sm:$0xff] }
  0x37   :  { %495 = vmatpush.msra.mxu3 %v406_v15  ;;  %433 = vmatpush.msra.mxu0 %v411_v16  ;;  %v733_v5 = vld [vmem:[#allocation4 + $0x450] sm:$0xff]  ;;  %v734_v6 = vld [vmem:[#allocation4 + $0x458] sm:$0xff]  ;;  %v551_v7 = vld [vmem:[#allocation4 + $0x60] sm:$0xff] }
  0x38   :  { %453 = vmatpush.msra.mxu1 %v412_v17  ;;  %476 = vmatpush.msra.mxu2 %v401_v18  ;;  %v552_v8 = vld [vmem:[#allocation4 + $0x68] sm:$0xff]  ;;  %v739_v9 = vld [vmem:[#allocation4 + $0x5c0] sm:$0xff]  ;;  %v729_v11 = vld [vmem:[#allocation4 + $0x390] sm:$0xff] }
  0x39   :  { %496 = vmatpush.msra.mxu3 %v402_v19  ;;  %434 = vmatpush.msra.mxu0 %v407_v20  ;;  %v740_v10 = vld [vmem:[#allocation4 + $0x5c8] sm:$0xff]  ;;  %v730_v12 = vld [vmem:[#allocation4 + $0x398] sm:$0xff]  ;;  %v735_v13 = vld [vmem:[#allocation4 + $0x500] sm:$0xff] }
  0x3a   :  { %454 = vmatpush.msra.mxu1 %v408_v21  ;;  %477 = vmatpush.msra.mxu2 %v397_v22  ;;  %v736_v14 = vld [vmem:[#allocation4 + $0x508] sm:$0xff]  ;;  %v725_v15 = vld [vmem:[#allocation4 + $0x2d0] sm:$0xff]  ;;  %v726_v16 = vld [vmem:[#allocation4 + $0x2d8] sm:$0xff] }
  0x3b   :  { %497 = vmatpush.msra.mxu3 %v398_v23  ;;  %435 = vmatpush.msra.mxu0 %v403_v24  ;;  %v731_v17 = vld [vmem:[#allocation4 + $0x440] sm:$0xff]  ;;  %v732_v18 = vld [vmem:[#allocation4 + $0x448] sm:$0xff]  ;;  %v721_v19 = vld [vmem:[#allocation4 + $0x210] sm:$0xff] }
  0x3c   :  { %455 = vmatpush.msra.mxu1 %v404_v25  ;;  %478 = vmatpush.msra.mxu2 %v393_v26  ;;  %v722_v20 = vld [vmem:[#allocation4 + $0x218] sm:$0xff]  ;;  %v727_v21 = vld [vmem:[#allocation4 + $0x380] sm:$0xff]  ;;  %v728_v22 = vld [vmem:[#allocation4 + $0x388] sm:$0xff] }
  0x3d   :  { %498 = vmatpush.msra.mxu3 %v394_v27  ;;  %1053 = vmatmul.msk.f32.vlgmr.msra.gmra.mxu2 %vm94_vm0, %v1222_v29  ;;  %v717_v23 = vld [vmem:[#allocation4 + $0x150] sm:$0xff]  ;;  %v718_v24 = vld [vmem:[#allocation4 + $0x158] sm:$0xff]  ;;  %v723_v25 = vld [vmem:[#allocation4 + $0x2c0] sm:$0xff] }
  0x3e   :  { %1054 = vmatmul.msk.f32.vlgmr.msra.gmra.mxu3 %vm94_vm0, %v1222_v29  ;;  %631 = vmatpush.msrb.mxu2 %v581_v28  ;;  %v724_v26 = vld [vmem:[#allocation4 + $0x2c8] sm:$0xff]  ;;  %v713_v27 = vld [vmem:[#allocation4 + $0x90] sm:$0xff]  ;;  %v714_v28 = vld [vmem:[#allocation4 + $0x98] sm:$0xff] }
  0x3f   :  { %651 = vmatpush.msrb.mxu3 %v582_v30  ;;  %436 = vmatpush.msra.mxu0 %v399_v31  ;;  %v902_v30 = vld [vmem:[#allocation4 + $0x5f8] sm:$0xff]  ;;  %v719_v31 = vld [vmem:[#allocation4 + $0x200] sm:$0xff] }
  0x40   :  { %456 = vmatpush.msra.mxu1 %v400_v32  ;;  %632 = vmatpush.msrb.mxu2 %v577_v33  ;;  %v720_v32 = vld [vmem:[#allocation4 + $0x208] sm:$0xff]  ;;  %v901_v33 = vld [vmem:[#allocation4 + $0x5f0] sm:$0xff] }
  0x41   :  { %652 = vmatpush.msrb.mxu3 %v578_v34  ;;  %437 = vmatpush.msra.mxu0 %v395_v35  ;;  %v898_v34 = vld [vmem:[#allocation4 + $0x538] sm:$0xff]  ;;  %v715_v35 = vld [vmem:[#allocation4 + $0x140] sm:$0xff] }
  0x42   :  { %457 = vmatpush.msra.mxu1 %v396_v36  ;;  %633 = vmatpush.msrb.mxu2 %v573_v37  ;;  %v716_v36 = vld [vmem:[#allocation4 + $0x148] sm:$0xff]  ;;  %v897_v37 = vld [vmem:[#allocation4 + $0x530] sm:$0xff] }
  0x43   :  { %653 = vmatpush.msrb.mxu3 %v574_v38  ;;  %438 = vmatpush.msra.mxu0 %v391_v39  ;;  %v894_v38 = vld [vmem:[#allocation4 + $0x478] sm:$0xff]  ;;  %v711_v39 = vld [vmem:[#allocation4 + $0x80] sm:$0xff] }
  0x44   :  { %458 = vmatpush.msra.mxu1 %v392_v40  ;;  %1051 = vmatmul.msk.f32.vlgmr.msra.gmra.mxu0 %vm94_vm0, %v1222_v29  ;;  %v712_v40 = vld [vmem:[#allocation4 + $0x88] sm:$0xff] }
  0x45   :  { %1052 = vmatmul.msk.f32.vlgmr.msra.gmra.mxu1 %vm94_vm0, %v1222_v29  ;;  %591 = vmatpush.msrb.mxu0 %v579_v41  ;;  %v893_v41 = vld [vmem:[#allocation4 + $0x470] sm:$0xff] }
  0x46   :  { %611 = vmatpush.msrb.mxu1 %v580_v42  ;;  %634 = vmatpush.msrb.mxu2 %v569_v43  ;;  %v890_v42 = vld [vmem:[#allocation4 + $0x3b8] sm:$0xff]  ;;  %v899_v43 = vld [vmem:[#allocation4 + $0x5e0] sm:$0xff] }
  0x47   :  { %654 = vmatpush.msrb.mxu3 %v570_v44  ;;  %592 = vmatpush.msrb.mxu0 %v575_v45  ;;  %v900_v44 = vld [vmem:[#allocation4 + $0x5e8] sm:$0xff]  ;;  %v889_v45 = vld [vmem:[#allocation4 + $0x3b0] sm:$0xff] }
  0x48   :  { %612 = vmatpush.msrb.mxu1 %v576_v46  ;;  %635 = vmatpush.msrb.mxu2 %v565_v47  ;;  %v886_v46 = vld [vmem:[#allocation4 + $0x2f8] sm:$0xff]  ;;  %v895_v47 = vld [vmem:[#allocation4 + $0x520] sm:$0xff] }
  0x49   :  { %655 = vmatpush.msrb.mxu3 %v566_v48  ;;  %593 = vmatpush.msrb.mxu0 %v571_v49  ;;  %v896_v48 = vld [vmem:[#allocation4 + $0x528] sm:$0xff]  ;;  %v885_v49 = vld [vmem:[#allocation4 + $0x2f0] sm:$0xff] }
  0x4a   :  { %613 = vmatpush.msrb.mxu1 %v572_v50  ;;  %636 = vmatpush.msrb.mxu2 %v561_v51  ;;  %v882_v50 = vld [vmem:[#allocation4 + $0x238] sm:$0xff]  ;;  %v891_v51 = vld [vmem:[#allocation4 + $0x460] sm:$0xff] }
  0x4b   :  { %656 = vmatpush.msrb.mxu3 %v562_v52  ;;  %594 = vmatpush.msrb.mxu0 %v567_v53  ;;  %v892_v52 = vld [vmem:[#allocation4 + $0x468] sm:$0xff]  ;;  %v881_v53 = vld [vmem:[#allocation4 + $0x230] sm:$0xff] }
  0x4c   :  { %614 = vmatpush.msrb.mxu1 %v568_v54  ;;  %637 = vmatpush.msrb.mxu2 %v557_v55  ;;  %v878_v54 = vld [vmem:[#allocation4 + $0x178] sm:$0xff]  ;;  %v887_v55 = vld [vmem:[#allocation4 + $0x3a0] sm:$0xff] }
  0x4d   :  { %657 = vmatpush.msrb.mxu3 %v558_v56  ;;  %595 = vmatpush.msrb.mxu0 %v563_v57  ;;  %v888_v56 = vld [vmem:[#allocation4 + $0x3a8] sm:$0xff]  ;;  %v877_v57 = vld [vmem:[#allocation4 + $0x170] sm:$0xff] }
  0x4e   :  { %615 = vmatpush.msrb.mxu1 %v564_v58  ;;  %638 = vmatpush.msrb.mxu2 %v553_v59  ;;  %v874_v58 = vld [vmem:[#allocation4 + $0xb8] sm:$0xff]  ;;  %v883_v59 = vld [vmem:[#allocation4 + $0x2e0] sm:$0xff] }
  0x4f   :  { %658 = vmatpush.msrb.mxu3 %v554_v60  ;;  %1057 = vmatmul.msk.f32.vlgmr.msrb.gmra.mxu2 %vm94_vm0, %v1222_v29  ;;  %v884_v60 = vld [vmem:[#allocation4 + $0x2e8] sm:$0xff] }
  0x50   :  { %1058 = vmatmul.msk.f32.vlgmr.msrb.gmra.mxu3 %vm94_vm0, %v1222_v29  ;;  %791 = vmatpush.msra.mxu2 %v741_v61  ;;  %v873_v61 = vld [vmem:[#allocation4 + $0xb0] sm:$0xff] }
  0x51   :  { %811 = vmatpush.msra.mxu3 %v742_v62  ;;  %596 = vmatpush.msrb.mxu0 %v559_v63  ;;  %v879_v62 = vld [vmem:[#allocation4 + $0x220] sm:$0xff]  ;;  %v880_v63 = vld [vmem:[#allocation4 + $0x228] sm:$0xff] }
  0x52   :  { %616 = vmatpush.msrb.mxu1 %v560_v0  ;;  %792 = vmatpush.msra.mxu2 %v737_v1  ;;  %v875_v0 = vld [vmem:[#allocation4 + $0x160] sm:$0xff]  ;;  %v876_v1 = vld [vmem:[#allocation4 + $0x168] sm:$0xff] }
  0x53   :  { %812 = vmatpush.msra.mxu3 %v738_v2  ;;  %597 = vmatpush.msrb.mxu0 %v555_v3  ;;  %v871_v2 = vld [vmem:[#allocation4 + $0xa0] sm:$0xff]  ;;  %v872_v3 = vld [vmem:[#allocation4 + $0xa8] sm:$0xff] }
  0x54   :  { %617 = vmatpush.msrb.mxu1 %v556_v4  ;;  %793 = vmatpush.msra.mxu2 %v733_v5 }
  0x55   :  { %813 = vmatpush.msra.mxu3 %v734_v6  ;;  %598 = vmatpush.msrb.mxu0 %v551_v7 }
  0x56   :  { %618 = vmatpush.msrb.mxu1 %v552_v8  ;;  %1055 = vmatmul.msk.f32.vlgmr.msrb.gmra.mxu0 %vm94_vm0, %v1222_v29 }
  0x57   :  { %1056 = vmatmul.msk.f32.vlgmr.msrb.gmra.mxu1 %vm94_vm0, %v1222_v29  ;;  %751 = vmatpush.msra.mxu0 %v739_v9 }
  0x58   :  { %771 = vmatpush.msra.mxu1 %v740_v10  ;;  %794 = vmatpush.msra.mxu2 %v729_v11 }
  0x59   :  { %814 = vmatpush.msra.mxu3 %v730_v12  ;;  %752 = vmatpush.msra.mxu0 %v735_v13 }
  0x5a   :  { %772 = vmatpush.msra.mxu1 %v736_v14  ;;  %795 = vmatpush.msra.mxu2 %v725_v15 }
  0x5b   :  { %815 = vmatpush.msra.mxu3 %v726_v16  ;;  %753 = vmatpush.msra.mxu0 %v731_v17 }
  0x5c   :  { %773 = vmatpush.msra.mxu1 %v732_v18  ;;  %796 = vmatpush.msra.mxu2 %v721_v19 }
  0x5d   :  { %816 = vmatpush.msra.mxu3 %v722_v20  ;;  %754 = vmatpush.msra.mxu0 %v727_v21 }
  0x5e   :  { %774 = vmatpush.msra.mxu1 %v728_v22  ;;  %797 = vmatpush.msra.mxu2 %v717_v23 }
  0x5f   :  { %817 = vmatpush.msra.mxu3 %v718_v24  ;;  %755 = vmatpush.msra.mxu0 %v723_v25 }
  0x60   :  { %775 = vmatpush.msra.mxu1 %v724_v26  ;;  %798 = vmatpush.msra.mxu2 %v713_v27 }
  0x61   :  { %818 = vmatpush.msra.mxu3 %v714_v28  ;;  %1061 = vmatmul.msk.f32.vlgmr.msra.gmra.mxu2 %vm94_vm0, %v1222_v29 }
  0x62   :  { %1062 = vmatmul.msk.f32.vlgmr.msra.gmra.mxu3 %vm94_vm0, %v1222_v29  ;;  %756 = vmatpush.msra.mxu0 %v719_v31 }
  0x63   :  { %971 = vmatpush.msrb.mxu3 %v902_v30  ;;  %776 = vmatpush.msra.mxu1 %v720_v32  ;;  %v1193_v32 = vmov -inf  }
  0x64   :  { %951 = vmatpush.msrb.mxu2 %v901_v33  ;;  %757 = vmatpush.msra.mxu0 %v715_v35  ;;  %54 = vst.msk [vmem:[%s1446_s2] sm:$0xff] %vm53_vm1, %v1193_v32  ;;  %v178_v35 = vlaneseq }
  0x65   :  { %972 = vmatpush.msrb.mxu3 %v898_v34  ;;  %777 = vmatpush.msra.mxu1 %v716_v36 }
  0x66   :  { %952 = vmatpush.msrb.mxu2 %v897_v37  ;;  %758 = vmatpush.msra.mxu0 %v711_v39 }
  0x67   :  { %973 = vmatpush.msrb.mxu3 %v894_v38  ;;  %778 = vmatpush.msra.mxu1 %v712_v40 }
  0x68   :  { %953 = vmatpush.msrb.mxu2 %v893_v41  ;;  %1059 = vmatmul.msk.f32.vlgmr.msra.gmra.mxu0 %vm94_vm0, %v1222_v29  ;;  %v179_v41 = vand.u32 127, %v178_v35 }
  0x69   :  { %1060 = vmatmul.msk.f32.vlgmr.msra.gmra.mxu1 %vm94_vm0, %v1222_v29  ;;  %974 = vmatpush.msrb.mxu3 %v890_v42 }
  0x6a   :  { %911 = vmatpush.msrb.mxu0 %v899_v43  ;;  %931 = vmatpush.msrb.mxu1 %v900_v44  ;;  %v182_v42 = vadd.s32 384, %v179_v41 }
  0x6b   :  { %954 = vmatpush.msrb.mxu2 %v889_v45  ;;  %975 = vmatpush.msrb.mxu3 %v886_v46 }
  0x6c   :  { %912 = vmatpush.msrb.mxu0 %v895_v47  ;;  %932 = vmatpush.msrb.mxu1 %v896_v48  ;;  %v988_v43 = vadd.s32 2560, %v182_v42 }
  0x6d   :  { %955 = vmatpush.msrb.mxu2 %v885_v49  ;;  %976 = vmatpush.msrb.mxu3 %v882_v50 }
  0x6e   :  { %913 = vmatpush.msrb.mxu0 %v891_v51  ;;  %933 = vmatpush.msrb.mxu1 %v892_v52  ;;  %vm992_vm2 = vcmp.lt.s32.totalorder %v988_v43, 3000  ;;  %v1194_v52 = vmov 0  }
  0x6f   :  { %956 = vmatpush.msrb.mxu2 %v881_v53  ;;  %977 = vmatpush.msrb.mxu3 %v878_v54  ;;  %v1351_v53 = vld [vmem:[%s1446_s2] sm:$0xff] }
  0x70   :  { %914 = vmatpush.msrb.mxu0 %v887_v55  ;;  %934 = vmatpush.msrb.mxu1 %v888_v56  ;;  %v1195_v56 = vmov 0.0  }
  0x71   :  { %957 = vmatpush.msrb.mxu2 %v877_v57  ;;  %978 = vmatpush.msrb.mxu3 %v874_v58  ;;  %55 = vst.msk [vmem:[%s1447_s3] sm:$0xff] %vm53_vm1, %v1195_v56 }
  0x72   :  { %915 = vmatpush.msrb.mxu0 %v883_v59  ;;  %935 = vmatpush.msrb.mxu1 %v884_v60 }
  0x73   :  { %958 = vmatpush.msrb.mxu2 %v873_v61  ;;  %1066 = vmatmul.msk.f32.vlgmr.msrb.gmra.mxu3 %vm94_vm0, %v1222_v29 }
  0x74   :  { %1065 = vmatmul.msk.f32.vlgmr.msrb.gmra.mxu2 %vm94_vm0, %v1222_v29  ;;  %916 = vmatpush.msrb.mxu0 %v879_v62 }
  0x75   :  { %936 = vmatpush.msrb.mxu1 %v880_v63  ;;  %1074 = vset.pattern.permute.xlu0 %v1194_v52 }
  0x76   :  { %917 = vmatpush.msrb.mxu0 %v875_v0  ;;  %1075 = vset.pattern.permute.xlu2 %v1194_v52 }
  0x77   :  { %937 = vmatpush.msrb.mxu1 %v876_v1  ;;  %1076 = vset.pattern.permute.xlu1 %v1194_v52 }
  0x78   :  { %918 = vmatpush.msrb.mxu0 %v871_v2 }
  0x79   :  { %938 = vmatpush.msrb.mxu1 %v872_v3  ;;  %1063 = vmatmul.msk.f32.vlgmr.msrb.gmra.mxu0 %vm94_vm0, %v1222_v29 }
  0x7a   :  { %1064 = vmatmul.msk.f32.vlgmr.msrb.gmra.mxu1 %vm94_vm0, %v1222_v29 }
  0x9c   :  { %v1272_v4 = vpop.f32.mrf.mxu0 }
  0x9e   :  { %v1274_v5 = vpop.f32.mrf.mxu1  ;;  %v1278_v7 = vpop.f32.mrf.mxu2 }
  0x9f   :  { %v197_v6 = vmax.f32 %v1272_v4, %v1274_v5  ;;  %v1280_v8 = vpop.f32.mrf.mxu3 }
  0xa0   :  { %v198_v9 = vmax.f32 %v1278_v7, %v1280_v8 }
  0xa2   :  { %v199_v10 = vmax.f32 %v197_v6, %v198_v9 }
  0xa4   :  { %200 = vmax.xlane.f32.xlu0 %v199_v10 }
  0xae   :  { %v1284_v11 = vpop.f32.mrf.mxu2 }
  0xaf   :  { %v1286_v12 = vpop.f32.mrf.mxu3  ;;  %v1288_v29 = vpop.f32.mrf.mxu0 }
  0xb0   :  { %v1290_v13 = vpop.f32.mrf.mxu1  ;;  %v358_v14 = vmax.f32 %v1284_v11, %v1286_v12 }
  0xb1   :  { %v357_v15 = vmax.f32 %v1288_v29, %v1290_v13 }
  0xb3   :  { %v359_v16 = vmax.f32 %v357_v15, %v358_v14 }
  0xb5   :  { %360 = vmax.xlane.f32.xlu1 %v359_v16 }
  0xc0   :  { %v1296_v17 = vpop.f32.mrf.mxu2 }
  0xc1   :  { %v1298_v18 = vpop.f32.mrf.mxu3  ;;  %v1300_v19 = vpop.f32.mrf.mxu0 }
  0xc2   :  { %v1302_v20 = vpop.f32.mrf.mxu1  ;;  %v518_v21 = vmax.f32 %v1296_v17, %v1298_v18 }
  0xc3   :  { %v517_v22 = vmax.f32 %v1300_v19, %v1302_v20 }
  0xc5   :  { %v519_v23 = vmax.f32 %v517_v22, %v518_v21 }
  0xc7   :  { %520 = vmax.xlane.f32.xlu2 %v519_v23 }
  0xd2   :  { %v1308_v24 = vpop.f32.mrf.mxu2 }
  0xd3   :  { %v1310_v25 = vpop.f32.mrf.mxu3  ;;  %v1312_v26 = vpop.f32.mrf.mxu0 }
  0xd4   :  { %v1314_v27 = vpop.f32.mrf.mxu1  ;;  %v678_v28 = vmax.f32 %v1308_v24, %v1310_v25 }
  0xd5   :  { %v677_v30 = vmax.f32 %v1312_v26, %v1314_v27 }
  0xd7   :  { %v679_v31 = vmax.f32 %v677_v30, %v678_v28 }
  0xd9   :  { %680 = vmax.xlane.f32.xlu1 %v679_v31 }
  0xe4   :  { %v1324_v33 = vpop.f32.mrf.mxu2 }
  0xe5   :  { %v1326_v34 = vpop.f32.mrf.mxu3  ;;  %v1328_v36 = vpop.f32.mrf.mxu0 }
  0xe6   :  { %v1330_v37 = vpop.f32.mrf.mxu1  ;;  %v838_v38 = vmax.f32 %v1324_v33, %v1326_v34 }
  0xe7   :  { %v837_v39 = vmax.f32 %v1328_v36, %v1330_v37 }
  0xe9   :  { %v839_v40 = vmax.f32 %v837_v39, %v838_v38 }
  0xeb   :  { %840 = vmax.xlane.f32.xlu1 %v839_v40 }
  0xf6   :  { %v980_v44 = vpop.f32.mrf.mxu3  ;;  %v1336_v45 = vpop.f32.mrf.mxu0 }
  0xf7   :  { %v1338_v46 = vsel %vm992_vm2, %v980_v44, -1e+30  ;;  %v1340_v47 = vpop.f32.mrf.mxu1  ;;  %v1342_v48 = vpop.f32.mrf.mxu2 }
  0xf8   :  { %v997_v49 = vmax.f32 %v1336_v45, %v1340_v47  ;;  %v998_v50 = vmax.f32 %v1342_v48, %v1338_v46 }
  0xfa   :  { %v999_v51 = vmax.f32 %v997_v49, %v998_v50 }
  0xfc   :  { %1000 = vmax.xlane.f32.xlu1 %v999_v51 }
 0x117   :  { %v201_v54 = vpop.xlane.xlu0 %200 }
 0x118   :  { %v1354_v55 = vmax.f32 %v1351_v53, %v201_v54 }
 0x11a   :  { %209 = vperm.xlu0 %1074, %v1354_v55  }
 0x128   :  { %v361_v57 = vpop.xlane.xlu1 %360 }
 0x129   :  { %v1362_v58 = vmax.f32 %v1354_v55, %v361_v57 }
 0x12b   :  { %v363_v59 = vsub.f32 %v1354_v55, %v1362_v58  ;;  %369 = vperm.xlu2 %1075, %v1362_v58  }
 0x13a   :  { %v521_v60 = vpop.xlane.xlu2 %520 }
 0x13b   :  { %v1368_v61 = vmax.f32 %v1362_v58, %v521_v60 }
 0x13d   :  { %v523_v62 = vsub.f32 %v1362_v58, %v1368_v61  ;;  %529 = vperm.xlu1 %1076, %v1368_v61  }
 0x14c   :  { %v681_v63 = vpop.xlane.xlu1 %680 }
 0x14d   :  { %v1374_v0 = vmax.f32 %v1368_v61, %v681_v63 }
 0x14f   :  { %v683_v1 = vsub.f32 %v1368_v61, %v1374_v0  ;;  %689 = vperm.xlu0 %1074, %v1374_v0  }
 0x151   :  { %v684_v58 = vmul.f32 1.442695, %v683_v1 }
 0x15e   :  { %v841_v2 = vpop.xlane.xlu1 %840 }
 0x15f   :  { %v1380_v3 = vmax.f32 %v1374_v0, %v841_v2 }
 0x161   :  { %v843_v6 = vsub.f32 %v1374_v0, %v1380_v3  ;;  %849 = vperm.xlu0 %1074, %v1380_v3  }
 0x16f   :  { %v1001_v9 = vpop.xlane.xlu1 %1000 }
 0x170   :  { %v1386_v10 = vmax.f32 %v1380_v3, %v1001_v9 }
 0x172   :  { %v1003_v14 = vsub.f32 %v1380_v3, %v1386_v10  ;;  %1031 = vst.msk [vmem:[%s1446_s2] sm:$0xff] %vm53_vm1, %v1386_v10  ;;  %1009 = vperm.xlu0 %1074, %v1386_v10  }
 0x185   :  { %v370_v15 = vpop.permute.xlu2 %369 }
 0x186   :  { %v372_v16 = vsub.f32 %v1288_v29, %v370_v15  ;;  %v373_v21 = vsub.f32 %v1290_v13, %v370_v15  ;;  %v374_v22 = vsub.f32 %v1284_v11, %v370_v15  ;;  %v375_v23 = vsub.f32 %v1286_v12, %v370_v15 }
 0x188   :  { %v376_v28 = vmul.f32 1.442695, %v372_v16  ;;  %v378_v30 = vmul.f32 1.442695, %v373_v21  ;;  %v380_v31 = vmul.f32 1.442695, %v374_v22 }
 0x189   :  { %v382_v32 = vmul.f32 1.442695, %v375_v23 }
 0x18a   :  { %1077 = vpow2.f32 %v376_v28 }
 0x18b   :  { %1079 = vpow2.f32 %v378_v30 }
 0x18c   :  { %v210_v35 = vpop.permute.xlu0 %209  ;;  %1081 = vpow2.f32 %v380_v31 }
 0x18d   :  { %v212_v38 = vsub.f32 %v1272_v4, %v210_v35  ;;  %v213_v39 = vsub.f32 %v1274_v5, %v210_v35  ;;  %v214_v29 = vsub.f32 %v1278_v7, %v210_v35  ;;  %v215_v13 = vsub.f32 %v1280_v8, %v210_v35 }
 0x18e   :  { %1083 = vpow2.f32 %v382_v32 }
 0x18f   :  { %v216_v11 = vmul.f32 1.442695, %v212_v38  ;;  %v218_v40 = vmul.f32 1.442695, %v213_v39  ;;  %v220_v41 = vmul.f32 1.442695, %v214_v29 }
 0x190   :  { %v1078_v12 = vpop.eup %1077  ;;  %v222_v43 = vmul.f32 1.442695, %v215_v13 }
 0x191   :  { %v1080_v42 = vpop.eup %1079  ;;  %1085 = vpow2.f32 %v216_v11 }
 0x192   :  { %1087 = vpow2.f32 %v218_v40  ;;  %v384_v44 = vadd.f32 %v1080_v42, %v1078_v12  ;;  %v1082_v49 = vpop.eup %1081 }
 0x193   :  { %1089 = vpow2.f32 %v220_v41 }
 0x194   :  { %v385_v50 = vadd.f32 %v1082_v49, %v384_v44  ;;  %v1084_v4 = vpop.eup %1083  ;;  %1091 = vpow2.f32 %v222_v43 }
 0x196   :  { %v386_v5 = vadd.f32 %v1084_v4, %v385_v50 }
 0x197   :  { %v1086_v51 = vpop.eup %1085 }
 0x198   :  { %v1088_v7 = vpop.eup %1087  ;;  %387 = vadd.xlane.f32.xlu2 %v386_v5 }
 0x199   :  { %v224_v8 = vadd.f32 %v1088_v7, %v1086_v51  ;;  %v1090_v52 = vpop.eup %1089 }
 0x19a   :  { %v1092_v56 = vpop.eup %1091 }
 0x19b   :  { %v225_v54 = vadd.f32 %v1090_v52, %v224_v8 }
 0x19d   :  { %v226_v57 = vadd.f32 %v1092_v56, %v225_v54 }
 0x19f   :  { %227 = vadd.xlane.f32.xlu1 %v226_v57 }
 0x1af   :  { %v530_v60 = vpop.permute.xlu1 %529 }
 0x1b0   :  { %v532_v63 = vsub.f32 %v1300_v19, %v530_v60  ;;  %v533_v2 = vsub.f32 %v1302_v20, %v530_v60  ;;  %v534_v9 = vsub.f32 %v1296_v17, %v530_v60  ;;  %v535_v15 = vsub.f32 %v1298_v18, %v530_v60 }
 0x1b2   :  { %v536_v16 = vmul.f32 1.442695, %v532_v63  ;;  %v538_v21 = vmul.f32 1.442695, %v533_v2  ;;  %v540_v22 = vmul.f32 1.442695, %v534_v9 }
 0x1b3   :  { %v542_v23 = vmul.f32 1.442695, %v535_v15 }
 0x1b4   :  { %1093 = vpow2.f32 %v536_v16 }
 0x1b5   :  { %1095 = vpow2.f32 %v538_v21 }
 0x1b6   :  { %1097 = vpow2.f32 %v540_v22 }
 0x1b7   :  { %1099 = vpow2.f32 %v542_v23 }
 0x1ba   :  { %v1094_v28 = vpop.eup %1093 }
 0x1bb   :  { %v1096_v30 = vpop.eup %1095 }
 0x1bc   :  { %v544_v31 = vadd.f32 %v1096_v30, %v1094_v28  ;;  %v1098_v32 = vpop.eup %1097 }
 0x1bd   :  { %v1100_v19 = vpop.eup %1099 }
 0x1be   :  { %v545_v35 = vadd.f32 %v1098_v32, %v544_v31 }
 0x1c0   :  { %v546_v38 = vadd.f32 %v1100_v19, %v545_v35  ;;  %v364_v19 = vmul.f32 1.442695, %v363_v59 }
 0x1c1   :  { %v690_v20 = vpop.permute.xlu0 %689 }
 0x1c2   :  { %v692_v17 = vsub.f32 %v1312_v26, %v690_v20  ;;  %v693_v18 = vsub.f32 %v1314_v27, %v690_v20  ;;  %v694_v39 = vsub.f32 %v1308_v24, %v690_v20  ;;  %547 = vadd.xlane.f32.xlu1 %v546_v38  ;;  %v695_v29 = vsub.f32 %v1310_v25, %v690_v20 }
 0x1c3   :  { %v524_v20 = vmul.f32 1.442695, %v523_v62 }
 0x1c4   :  { %v696_v13 = vmul.f32 1.442695, %v692_v17  ;;  %v698_v11 = vmul.f32 1.442695, %v693_v18  ;;  %v700_v40 = vmul.f32 1.442695, %v694_v39 }
 0x1c5   :  { %v702_v12 = vmul.f32 1.442695, %v695_v29  ;;  %v61_v17 = vld [vmem:[%s1447_s3] sm:$0xff] }
 0x1c6   :  { %1101 = vpow2.f32 %v696_v13 }
 0x1c7   :  { %1103 = vpow2.f32 %v698_v11 }
 0x1c8   :  { %1105 = vpow2.f32 %v700_v40 }
 0x1c9   :  { %1107 = vpow2.f32 %v702_v12 }
 0x1cc   :  { %v1102_v41 = vpop.eup %1101 }
 0x1cd   :  { %v1104_v42 = vpop.eup %1103 }
 0x1ce   :  { %v704_v43 = vadd.f32 %v1104_v42, %v1102_v41  ;;  %v1106_v44 = vpop.eup %1105 }
 0x1cf   :  { %v1108_v49 = vpop.eup %1107 }
 0x1d0   :  { %v705_v26 = vadd.f32 %v1106_v44, %v704_v43  ;;  %v844_v43 = vmul.f32 1.442695, %v843_v6 }
 0x1d2   :  { %v706_v27 = vadd.f32 %v1108_v49, %v705_v26 }
 0x1d3   :  { %v850_v50 = vpop.permute.xlu0 %849 }
 0x1d4   :  { %v852_v24 = vsub.f32 %v1328_v36, %v850_v50  ;;  %v853_v25 = vsub.f32 %v1330_v37, %v850_v50  ;;  %v854_v4 = vsub.f32 %v1324_v33, %v850_v50  ;;  %707 = vadd.xlane.f32.xlu0 %v706_v27  ;;  %v855_v5 = vsub.f32 %v1326_v34, %v850_v50 }
 0x1d5   :  { %v1004_v50 = vmul.f32 1.442695, %v1003_v14 }
 0x1d6   :  { %v856_v51 = vmul.f32 1.442695, %v852_v24  ;;  %v858_v7 = vmul.f32 1.442695, %v853_v25  ;;  %v860_v8 = vmul.f32 1.442695, %v854_v4 }
 0x1d7   :  { %v862_v52 = vmul.f32 1.442695, %v855_v5 }
 0x1d8   :  { %1109 = vpow2.f32 %v856_v51 }
 0x1d9   :  { %1111 = vpow2.f32 %v858_v7 }
 0x1da   :  { %1113 = vpow2.f32 %v860_v8 }
 0x1db   :  { %1115 = vpow2.f32 %v862_v52 }
 0x1de   :  { %v1110_v54 = vpop.eup %1109 }
 0x1df   :  { %v1112_v56 = vpop.eup %1111 }
 0x1e0   :  { %v864_v57 = vadd.f32 %v1112_v56, %v1110_v54  ;;  %v1114_v60 = vpop.eup %1113 }
 0x1e1   :  { %v1116_v63 = vpop.eup %1115 }
 0x1e2   :  { %v865_v36 = vadd.f32 %v1114_v60, %v864_v57 }
 0x1e4   :  { %v866_v37 = vadd.f32 %v1116_v63, %v865_v36  ;;  %v1010_v2 = vpop.permute.xlu0 %1009 }
 0x1e5   :  { %v1012_v33 = vsub.f32 %v1336_v45, %v1010_v2  ;;  %v1013_v34 = vsub.f32 %v1340_v47, %v1010_v2  ;;  %v1014_v9 = vsub.f32 %v1342_v48, %v1010_v2  ;;  %v1015_v15 = vsub.f32 %v1338_v46, %v1010_v2 }
 0x1e6   :  { %867 = vadd.xlane.f32.xlu2 %v866_v37  ;;  %v203_v48 = vsub.f32 %v1351_v53, %v1354_v55 }
 0x1e7   :  { %v1016_v16 = vmul.f32 1.442695, %v1012_v33  ;;  %v1018_v21 = vmul.f32 1.442695, %v1013_v34  ;;  %v1020_v22 = vmul.f32 1.442695, %v1014_v9 }
 0x1e8   :  { %v1022_v23 = vmul.f32 1.442695, %v1015_v15  ;;  %v204_v46 = vmul.f32 1.442695, %v203_v48 }
 0x1e9   :  { %1117 = vpow2.f32 %v1016_v16 }
 0x1ea   :  { %1119 = vpow2.f32 %v1018_v21 }
 0x1eb   :  { %1121 = vpow2.f32 %v1020_v22 }
 0x1ec   :  { %1123 = vpow2.f32 %v1022_v23 }
 0x1ed   :  { %1125 = vpow2.f32 %v204_v46 }
 0x1ee   :  { %1127 = vpow2.f32 %v364_v19 }
 0x1ef   :  { %v1118_v28 = vpop.eup %1117  ;;  %1129 = vpow2.f32 %v524_v20 }
 0x1f0   :  { %v1120_v30 = vpop.eup %1119  ;;  %1131 = vpow2.f32 %v684_v58 }
 0x1f1   :  { %v1024_v31 = vadd.f32 %v1120_v30, %v1118_v28  ;;  %v1122_v32 = vpop.eup %1121  ;;  %1133 = vpow2.f32 %v844_v43 }
 0x1f2   :  { %v1124_v35 = vpop.eup %1123  ;;  %1135 = vpow2.f32 %v1004_v50 }
 0x1f3   :  { %v1025_v45 = vadd.f32 %v1122_v32, %v1024_v31  ;;  %v1126_v38 = vpop.eup %1125 }
 0x1f4   :  { %v206_v18 = vmul.f32 %v1126_v38, %v61_v17  ;;  %v1128_v29 = vpop.eup %1127 }
 0x1f5   :  { %v1026_v47 = vadd.f32 %v1124_v35, %v1025_v45  ;;  %v1130_v55 = vpop.eup %1129 }
 0x1f6   :  { %v1132_v41 = vpop.eup %1131 }
 0x1f7   :  { %1027 = vadd.xlane.f32.xlu2 %v1026_v47  ;;  %v1134_v49 = vpop.eup %1133 }
 0x1f8   :  { %v1136_v24 = vpop.eup %1135 }
 0x20b   :  { %v388_v11 = vpop.xlane.xlu2 %387 }
 0x212   :  { %v228_v39 = vpop.xlane.xlu1 %227 }
 0x213   :  { %v229_v53 = vadd.f32 %v228_v39, %v206_v18 }
 0x215   :  { %v366_v13 = vmul.f32 %v1128_v29, %v229_v53 }
 0x217   :  { %v389_v40 = vadd.f32 %v388_v11, %v366_v13 }
 0x219   :  { %v526_v59 = vmul.f32 %v1130_v55, %v389_v40 }
 0x235   :  { %v548_v62 = vpop.xlane.xlu1 %547 }
 0x236   :  { %v549_v12 = vadd.f32 %v548_v62, %v526_v59 }
 0x238   :  { %v686_v42 = vmul.f32 %v1132_v41, %v549_v12 }
 0x247   :  { %v708_v44 = vpop.xlane.xlu0 %707 }
 0x248   :  { %v709_v26 = vadd.f32 %v708_v44, %v686_v42 }
 0x24a   :  { %v846_v27 = vmul.f32 %v1134_v49, %v709_v26 }
 0x259   :  { %v868_v61 = vpop.xlane.xlu2 %867 }
 0x25a   :  { %v869_v1 = vadd.f32 %v868_v61, %v846_v27 }
 0x25c   :  { %v1006_v25 = vmul.f32 %v1136_v24, %v869_v1 }
 0x26a   :  { %v1028_v4 = vpop.xlane.xlu2 %1027 }
 0x26b   :  { %v1029_v5 = vadd.f32 %v1028_v4, %v1006_v25 }
 0x26d   :  { %1032 = vst.msk [vmem:[%s1447_s3] sm:$0xff] %vm53_vm1, %v1029_v5 }
 0x26e   :  { %1041 = vsyncpa [#allocation3], 1 }
 0x26f   :  { %1042 = vsyncpa [#allocation5], 1 }

</bundles_post_ra>
